<compile_context>
chip_gen: v7x
topology: tpu7x:2x2x1
jax: 0.10.0
libtpu: 0.0.40
codegen_flags: <defaults>
</compile_context>

<pallas_src>
import jax
import jax.numpy as jnp
from jax.experimental import pallas as pl
from jax.experimental.pallas import tpu as pltpu

EPS = 1e-5  # nn.GroupNorm default eps


def _group_norm(x, gamma, beta):
    # GroupNorm(num_groups=1) on (M, C) == per-row normalization over channels
    # with biased variance (PyTorch semantics) + affine.
    mean = jnp.mean(x, axis=-1, keepdims=True)
    xm = x - mean
    var = jnp.mean(xm * xm, axis=-1, keepdims=True)
    return xm * jax.lax.rsqrt(var + EPS) * gamma + beta


def att_dest_kernel(cd_ref, agts_ref, rep_ref, par_ref, w_ref, out_ref):
    # cd_ref   : (G*K, 4)  f32   columns = [ctr_x, ctr_y, dest_x, dest_y]
    # agts_ref : (G,   C)  bf16  UN-repeated agent features for this block
    # rep_ref  : (G*K, G)  bf16  constant 0/1 repeat matrix rep[g*K+k, g] = 1
    # par_ref  : (8,   C)  f32   [w_in0, w_in1, b_in, g_d1, b_d1, g_agt, b_agt, 0]
    # w_ref    : (3C,  C)  bf16  [w_d1 ; w_agt_top ; w_agt_bot]  (all (in,out))
    C = agts_ref.shape[1]
    p = par_ref[...]
    cd = cd_ref[...]

    # dist = agt_ctrs - dest_ctrs (per output row), f32.
    dx = cd[:, 0:1] - cd[:, 2:3]                               # (G*K, 1)
    dy = cd[:, 1:2] - cd[:, 3:4]                               # (G*K, 1)

    # dist head, layer 0: Linear(2, C) + bias + ReLU.
    # Contraction dim is only 2 -> broadcast FMA on the VPU, not an MXU matmul.
    h = dx * p[0:1, :] + dy * p[1:2, :] + p[2:3, :]            # (G*K, C) f32
    h = jnp.maximum(h, 0.0)

    # dist head, layer 1: Linear(C, C, bias=False) -> GroupNorm(1) -> ReLU.
    d = jnp.dot(h.astype(jnp.bfloat16), w_ref[0:C, :],
                preferred_element_type=jnp.float32)            # (G*K, C) f32
    d = jnp.maximum(_group_norm(d, p[3:4, :], p[4:5, :]), 0.0)

    # agt head: cat([d, agts_rep]) @ W == d @ W_top + agts_rep @ W_bot.
    # Hoist: agts @ W_bot computed once per agent (G rows), then expanded to
    # the K modes with the constant repeat matrix (exact row selection on MXU).
    a = jnp.dot(agts_ref[...], w_ref[2 * C:3 * C, :],
                preferred_element_type=jnp.float32)            # (G, C) f32
    a_rep = jnp.dot(rep_ref[...], a.astype(jnp.bfloat16),
                    preferred_element_type=jnp.float32)        # (G*K, C) f32
    x = jnp.dot(d.astype(jnp.bfloat16), w_ref[C:2 * C, :],
                preferred_element_type=jnp.float32) + a_rep    # (G*K, C) f32

    # GroupNorm(1) -> ReLU, then write (optionally bf16 to halve writeback).
    x = jnp.maximum(_group_norm(x, p[5:6, :], p[6:7, :]), 0.0)
    out_ref[...] = x.astype(out_ref.dtype)


def att_dest_forward(agts, agt_ctrs, dest_ctrs,
                     w_in, b_in, w_d1, g_d1, b_d1, w_agt, g_agt, b_agt,
                     *, block_agents=None, out_dtype=jnp.float32):
    """agts: (N, C), agt_ctrs: (N, 2), dest_ctrs: (N, K, 2) -> (N*K, C)."""
    N, C = agts.shape
    K = dest_ctrs.shape[1]
    M = N * K
    f32, bf16 = jnp.float32, jnp.bfloat16

    # Agent tile: a multiple of 8 (sublane) that divides N, capped at 128 so
    # the repeat-matrix matmul stays <= one extra (G*K,C,C)-class MXU pass
    # (raise to 256 on v6e/v7x if desired).  Fallback: one full block (legal,
    # since full-dim blocks always satisfy the (8,128) rule).
    if block_agents is None:
        block_agents = N
        g = 8
        while g <= min(128, N):
            if N % g == 0:
                block_agents = g
            g += 8
    G = block_agents
    if N % G != 0:
        raise ValueError(f"block_agents={G} must divide N={N}")
    if G != N and G % 8 != 0:
        raise ValueError(f"block_agents={G} must be a multiple of 8")
    BR = G * K                         # output rows per grid step
    grid = (N // G,)

    # ---- layout / dtype plumbing only (no forward-pass arithmetic here) ----
    ctr_rep = jnp.repeat(agt_ctrs.astype(f32), K, axis=0)        # (M, 2) tiny
    dest_flat = dest_ctrs.reshape(M, 2).astype(f32)              # (M, 2)
    cd = jnp.concatenate([ctr_rep, dest_flat], axis=1)           # (M, 4)

    agts_b = agts.astype(bf16)                                   # (N, C) UN-repeated

    # Constant 0/1 repeat matrix (agent-major interleave): rep[g*K + k, g] = 1.
    rep = jnp.repeat(jnp.eye(G, dtype=bf16), K, axis=0)          # (G*K, G)

    # Parameter slab (8, C) f32.
    par = jnp.concatenate([
        w_in.astype(f32).reshape(2, C),      # rows 0,1 : dist[0] weight.T
        b_in.astype(f32).reshape(1, C),      # row 2    : dist[0] bias
        g_d1.astype(f32).reshape(1, C),      # row 3    : dist[2] GN gamma
        b_d1.astype(f32).reshape(1, C),      # row 4    : dist[2] GN beta
        g_agt.astype(f32).reshape(1, C),     # row 5    : agt GN gamma
        b_agt.astype(f32).reshape(1, C),     # row 6    : agt GN beta
        jnp.zeros((1, C), f32),              # row 7    : pad
    ], axis=0)                                                   # (8, C)

    # Matmul weight slab (3C, C) bf16: [w_d1 ; w_agt_top ; w_agt_bot].
    w_pack = jnp.concatenate([
        w_d1.reshape(C, C),
        w_agt[:C].reshape(C, C),             # applied to dist feats
        w_agt[C:].reshape(C, C),             # applied to agts
    ], axis=0).astype(bf16)                                      # (3C, C)

    def const_spec(shape):
        return pl.BlockSpec(shape, lambda i: (0, 0))             # resident, one DMA

    in_specs = [
        pl.BlockSpec((BR, 4), lambda i: (i, 0)),   # cd rows for this agent block
        pl.BlockSpec((G, C), lambda i: (i, 0)),    # agts (un-repeated)
        const_spec((BR, G)),                       # repeat matrix
        const_spec((8, C)),                        # parameter slab
        const_spec((3 * C, C)),                    # weight slab
    ]
    out_specs = pl.BlockSpec((BR, C), lambda i: (i, 0))

    return pl.pallas_call(
        att_dest_kernel,
        out_shape=jax.ShapeDtypeStruct((M, C), out_dtype),
        grid=grid,
        in_specs=in_specs,
        out_specs=out_specs,
        compiler_params=pltpu.CompilerParams(
            dimension_semantics=("parallel",)),    # agent blocks independent
    )(cd, agts_b, rep, par, w_pack)


def att_dest_reference(agts, agt_ctrs, dest_ctrs,
                       w_in, b_in, w_d1, g_d1, b_d1, w_agt, g_agt, b_agt):
    """Pure-JAX f32 reference of the AttDest forward pass."""
    N, C = agts.shape
    K = dest_ctrs.shape[1]
    dist = (agt_ctrs[:, None, :] - dest_ctrs).reshape(-1, 2)
    h = jnp.maximum(dist @ w_in + b_in.reshape(1, C), 0.0)
    d = h @ w_d1
    d = jnp.maximum(_group_norm(d, g_d1.reshape(1, C), b_d1.reshape(1, C)), 0.0)
    agts_rep = jnp.repeat(agts, K, axis=0)
    x = jnp.concatenate([d, agts_rep], axis=1) @ w_agt
    x = jnp.maximum(_group_norm(x, g_agt.reshape(1, C), b_agt.reshape(1, C)), 0.0)
    return x


if __name__ == "__main__":
    key = jax.random.PRNGKey(0)
    N, K, C = 64, 6, 128          # n_actors, num_mods, n_agt (lane-dense C)
    ks = jax.random.split(key, 11)

    agts = jax.random.normal(ks[0], (N, C), jnp.float32)
    agt_ctrs = 10.0 * jax.random.normal(ks[1], (N, 2), jnp.float32)
    dest_ctrs = 10.0 * jax.random.normal(ks[2], (N, K, 2), jnp.float32)

    # Synthetic parameters (nn.Linear weights pre-transposed to (in, out)).
    s = 0.1
    w_in = s * jax.random.normal(ks[3], (2, C), jnp.float32)          # dist[0] weight.T
    b_in = s * jax.random.normal(ks[4], (C,), jnp.float32)            # dist[0] bias
    w_d1 = s * jax.random.normal(ks[5], (C, C), jnp.float32)          # dist[2].linear.weight.T
    g_d1 = 1.0 + 0.1 * jax.random.normal(ks[6], (C,), jnp.float32)    # dist[2].norm gamma
    b_d1 = 0.1 * jax.random.normal(ks[7], (C,), jnp.float32)          # dist[2].norm beta
    w_agt = s * jax.random.normal(ks[8], (2 * C, C), jnp.float32)     # agt.linear.weight.T
    g_agt = 1.0 + 0.1 * jax.random.normal(ks[9], (C,), jnp.float32)   # agt.norm gamma
    b_agt = 0.1 * jax.random.normal(ks[10], (C,), jnp.float32)        # agt.norm beta

    # block_agents=16 -> 4 pipelined grid steps at this demo size.
    out = att_dest_forward(agts, agt_ctrs, dest_ctrs,
                           w_in, b_in, w_d1, g_d1, b_d1, w_agt, g_agt, b_agt,
                           block_agents=16)
    out = jax.block_until_ready(out)

    ref = att_dest_reference(agts, agt_ctrs, dest_ctrs,
                             w_in, b_in, w_d1, g_d1, b_d1, w_agt, g_agt, b_agt)
    assert out.shape == (N * K, C)
    max_err = float(jnp.max(jnp.abs(out - ref)))
    # bf16 MXU operands with f32 accumulation / f32 GroupNorm: small tolerance.
    assert jnp.allclose(out, ref, rtol=2e-2, atol=5e-2), f"max_err={max_err}"
    print("KERNEL_OK")
</pallas_src>

<mosaic_0001>
module attributes {stable_mosaic.version = 11 : i64} {
  func.func @att_dest_kernel(%arg0: i32, %arg1: memref<96x4xf32, #tpu.memory_space<vmem>>, %arg2: memref<16x128xbf16, #tpu.memory_space<vmem>>, %arg3: memref<96x16xbf16, #tpu.memory_space<vmem>>, %arg4: memref<8x128xf32, #tpu.memory_space<vmem>>, %arg5: memref<384x128xbf16, #tpu.memory_space<vmem>>, %arg6: memref<96x128xf32, #tpu.memory_space<vmem>>) attributes {dimension_semantics = [#tpu.dimension_semantics<parallel>], iteration_bounds = array<i64: 4>, scalar_prefetch = 0 : i64, scratch_operands = 0 : i64, tpu.core_type = #tpu.core_type<tc>, window_params = [{transform_indices = @transform_0, window_bounds = array<i64: 96, 4>}, {transform_indices = @transform_1, window_bounds = array<i64: 16, 128>}, {pipeline_mode = #tpu.pipeline_mode<synchronous>, transform_indices = @transform_2, window_bounds = array<i64: 96, 16>}, {pipeline_mode = #tpu.pipeline_mode<synchronous>, transform_indices = @transform_3, window_bounds = array<i64: 8, 128>}, {pipeline_mode = #tpu.pipeline_mode<synchronous>, transform_indices = @transform_4, window_bounds = array<i64: 384, 128>}, {transform_indices = @transform_5, window_bounds = array<i64: 96, 128>}]} {
    %c0 = arith.constant 0 : index
    %c0_0 = arith.constant 0 : index
    %0 = vector.load %arg4[%c0, %c0_0] : memref<8x128xf32, #tpu.memory_space<vmem>>, vector<8x128xf32>
    %c0_1 = arith.constant 0 : index
    %c0_2 = arith.constant 0 : index
    %1 = vector.load %arg1[%c0_1, %c0_2] : memref<96x4xf32, #tpu.memory_space<vmem>>, vector<96x4xf32>
    %2 = vector.extract_strided_slice %1 {offsets = [0, 0], sizes = [96, 1], strides = [1, 1]} : vector<96x4xf32> to vector<96x1xf32>
    %3 = vector.extract_strided_slice %1 {offsets = [0, 2], sizes = [96, 1], strides = [1, 1]} : vector<96x4xf32> to vector<96x1xf32>
    %4 = arith.subf %2, %3 : vector<96x1xf32>
    %5 = vector.extract_strided_slice %1 {offsets = [0, 1], sizes = [96, 1], strides = [1, 1]} : vector<96x4xf32> to vector<96x1xf32>
    %6 = vector.extract_strided_slice %1 {offsets = [0, 3], sizes = [96, 1], strides = [1, 1]} : vector<96x4xf32> to vector<96x1xf32>
    %7 = arith.subf %5, %6 : vector<96x1xf32>
    %8 = vector.extract_strided_slice %0 {offsets = [0, 0], sizes = [1, 128], strides = [1, 1]} : vector<8x128xf32> to vector<1x128xf32>
    %9 = vector.broadcast %4 : vector<96x1xf32> to vector<96x128xf32>
    %10 = vector.broadcast %8 : vector<1x128xf32> to vector<96x128xf32>
    %11 = arith.mulf %9, %10 : vector<96x128xf32>
    %12 = vector.extract_strided_slice %0 {offsets = [1, 0], sizes = [1, 128], strides = [1, 1]} : vector<8x128xf32> to vector<1x128xf32>
    %13 = vector.broadcast %7 : vector<96x1xf32> to vector<96x128xf32>
    %14 = vector.broadcast %12 : vector<1x128xf32> to vector<96x128xf32>
    %15 = arith.mulf %13, %14 : vector<96x128xf32>
    %16 = arith.addf %11, %15 : vector<96x128xf32>
    %17 = vector.extract_strided_slice %0 {offsets = [2, 0], sizes = [1, 128], strides = [1, 1]} : vector<8x128xf32> to vector<1x128xf32>
    %18 = vector.broadcast %17 : vector<1x128xf32> to vector<96x128xf32>
    %19 = arith.addf %16, %18 : vector<96x128xf32>
    %cst = arith.constant 0.000000e+00 : f32
    %20 = vector.broadcast %cst : f32 to vector<96x128xf32>
    %21 = arith.maximumf %19, %20 : vector<96x128xf32>
    %22 = arith.truncf %21 : vector<96x128xf32> to vector<96x128xbf16>
    %c0_3 = arith.constant 0 : index
    %c0_4 = arith.constant 0 : index
    %23 = vector.load %arg5[%c0_3, %c0_4] : memref<384x128xbf16, #tpu.memory_space<vmem>>, vector<128x128xbf16>
    %cst_5 = arith.constant dense<0.000000e+00> : vector<96x128xf32>
    %24 = tpu.matmul %22, %23, %cst_5 {dimension_numbers = #tpu.dot_dimension_numbers<[1], [0], [0], [1], [0, 0, 1, 1], [], []>} : vector<96x128xbf16>, vector<128x128xbf16>, vector<96x128xf32> -> vector<96x128xf32>
    %25 = vector.extract_strided_slice %0 {offsets = [3, 0], sizes = [1, 128], strides = [1, 1]} : vector<8x128xf32> to vector<1x128xf32>
    %26 = vector.extract_strided_slice %0 {offsets = [4, 0], sizes = [1, 128], strides = [1, 1]} : vector<8x128xf32> to vector<1x128xf32>
    %cst_6 = arith.constant dense<0.000000e+00> : vector<96xf32>
    %27 = vector.multi_reduction <add>, %24, %cst_6 [1] : vector<96x128xf32> to vector<96xf32>
    %28 = vector.shape_cast %27 : vector<96xf32> to vector<96x1xf32>
    %cst_7 = arith.constant 1.280000e+02 : f32
    %29 = vector.broadcast %cst_7 : f32 to vector<96x1xf32>
    %30 = arith.divf %28, %29 : vector<96x1xf32>
    %31 = vector.broadcast %30 : vector<96x1xf32> to vector<96x128xf32>
    %32 = arith.subf %24, %31 : vector<96x128xf32>
    %33 = arith.mulf %32, %32 : vector<96x128xf32>
    %cst_8 = arith.constant dense<0.000000e+00> : vector<96xf32>
    %34 = vector.multi_reduction <add>, %33, %cst_8 [1] : vector<96x128xf32> to vector<96xf32>
    %35 = vector.shape_cast %34 : vector<96xf32> to vector<96x1xf32>
    %cst_9 = arith.constant 1.280000e+02 : f32
    %36 = vector.broadcast %cst_9 : f32 to vector<96x1xf32>
    %37 = arith.divf %35, %36 : vector<96x1xf32>
    %cst_10 = arith.constant 9.99999974E-6 : f32
    %38 = vector.broadcast %cst_10 : f32 to vector<96x1xf32>
    %39 = arith.addf %37, %38 : vector<96x1xf32>
    %40 = math.rsqrt %39 : vector<96x1xf32>
    %41 = vector.broadcast %40 : vector<96x1xf32> to vector<96x128xf32>
    %42 = arith.mulf %32, %41 : vector<96x128xf32>
    %43 = vector.broadcast %25 : vector<1x128xf32> to vector<96x128xf32>
    %44 = arith.mulf %42, %43 : vector<96x128xf32>
    %45 = vector.broadcast %26 : vector<1x128xf32> to vector<96x128xf32>
    %46 = arith.addf %44, %45 : vector<96x128xf32>
    %cst_11 = arith.constant 0.000000e+00 : f32
    %47 = vector.broadcast %cst_11 : f32 to vector<96x128xf32>
    %48 = arith.maximumf %46, %47 : vector<96x128xf32>
    %c0_12 = arith.constant 0 : index
    %c0_13 = arith.constant 0 : index
    %49 = vector.load %arg2[%c0_12, %c0_13] : memref<16x128xbf16, #tpu.memory_space<vmem>>, vector<16x128xbf16>
    %c256 = arith.constant 256 : index
    %c0_14 = arith.constant 0 : index
    %50 = vector.load %arg5[%c256, %c0_14] : memref<384x128xbf16, #tpu.memory_space<vmem>>, vector<128x128xbf16>
    %cst_15 = arith.constant dense<0.000000e+00> : vector<16x128xf32>
    %51 = tpu.matmul %49, %50, %cst_15 {dimension_numbers = #tpu.dot_dimension_numbers<[1], [0], [0], [1], [0, 0, 1, 1], [], []>} : vector<16x128xbf16>, vector<128x128xbf16>, vector<16x128xf32> -> vector<16x128xf32>
    %c0_16 = arith.constant 0 : index
    %c0_17 = arith.constant 0 : index
    %52 = vector.load %arg3[%c0_16, %c0_17] : memref<96x16xbf16, #tpu.memory_space<vmem>>, vector<96x16xbf16>
    %53 = arith.truncf %51 : vector<16x128xf32> to vector<16x128xbf16>
    %cst_18 = arith.constant dense<0.000000e+00> : vector<96x128xf32>
    %54 = tpu.matmul %52, %53, %cst_18 {dimension_numbers = #tpu.dot_dimension_numbers<[1], [0], [0], [1], [0, 0, 1, 1], [], []>} : vector<96x16xbf16>, vector<16x128xbf16>, vector<96x128xf32> -> vector<96x128xf32>
    %55 = arith.truncf %48 : vector<96x128xf32> to vector<96x128xbf16>
    %c128 = arith.constant 128 : index
    %c0_19 = arith.constant 0 : index
    %56 = vector.load %arg5[%c128, %c0_19] : memref<384x128xbf16, #tpu.memory_space<vmem>>, vector<128x128xbf16>
    %cst_20 = arith.constant dense<0.000000e+00> : vector<96x128xf32>
    %57 = tpu.matmul %55, %56, %cst_20 {dimension_numbers = #tpu.dot_dimension_numbers<[1], [0], [0], [1], [0, 0, 1, 1], [], []>} : vector<96x128xbf16>, vector<128x128xbf16>, vector<96x128xf32> -> vector<96x128xf32>
    %58 = arith.addf %57, %54 : vector<96x128xf32>
    %59 = vector.extract_strided_slice %0 {offsets = [5, 0], sizes = [1, 128], strides = [1, 1]} : vector<8x128xf32> to vector<1x128xf32>
    %60 = vector.extract_strided_slice %0 {offsets = [6, 0], sizes = [1, 128], strides = [1, 1]} : vector<8x128xf32> to vector<1x128xf32>
    %cst_21 = arith.constant dense<0.000000e+00> : vector<96xf32>
    %61 = vector.multi_reduction <add>, %58, %cst_21 [1] : vector<96x128xf32> to vector<96xf32>
    %62 = vector.shape_cast %61 : vector<96xf32> to vector<96x1xf32>
    %cst_22 = arith.constant 1.280000e+02 : f32
    %63 = vector.broadcast %cst_22 : f32 to vector<96x1xf32>
    %64 = arith.divf %62, %63 : vector<96x1xf32>
    %65 = vector.broadcast %64 : vector<96x1xf32> to vector<96x128xf32>
    %66 = arith.subf %58, %65 : vector<96x128xf32>
    %67 = arith.mulf %66, %66 : vector<96x128xf32>
    %cst_23 = arith.constant dense<0.000000e+00> : vector<96xf32>
    %68 = vector.multi_reduction <add>, %67, %cst_23 [1] : vector<96x128xf32> to vector<96xf32>
    %69 = vector.shape_cast %68 : vector<96xf32> to vector<96x1xf32>
    %cst_24 = arith.constant 1.280000e+02 : f32
    %70 = vector.broadcast %cst_24 : f32 to vector<96x1xf32>
    %71 = arith.divf %69, %70 : vector<96x1xf32>
    %cst_25 = arith.constant 9.99999974E-6 : f32
    %72 = vector.broadcast %cst_25 : f32 to vector<96x1xf32>
    %73 = arith.addf %71, %72 : vector<96x1xf32>
    %74 = math.rsqrt %73 : vector<96x1xf32>
    %75 = vector.broadcast %74 : vector<96x1xf32> to vector<96x128xf32>
    %76 = arith.mulf %66, %75 : vector<96x128xf32>
    %77 = vector.broadcast %59 : vector<1x128xf32> to vector<96x128xf32>
    %78 = arith.mulf %76, %77 : vector<96x128xf32>
    %79 = vector.broadcast %60 : vector<1x128xf32> to vector<96x128xf32>
    %80 = arith.addf %78, %79 : vector<96x128xf32>
    %cst_26 = arith.constant 0.000000e+00 : f32
    %81 = vector.broadcast %cst_26 : f32 to vector<96x128xf32>
    %82 = arith.maximumf %80, %81 : vector<96x128xf32>
    %c0_27 = arith.constant 0 : index
    %c0_28 = arith.constant 0 : index
    %83 = vector.load %arg6[%c0_27, %c0_28] : memref<96x128xf32, #tpu.memory_space<vmem>>, vector<96x128xf32>
    tpu.vector_store %arg6[%c0_27, %c0_28], %82 {strides = array<i32>} : memref<96x128xf32, #tpu.memory_space<vmem>>, vector<96x128xf32>,
    return
  }
  func.func @transform_0(%arg0: i32) -> (i32, i32) {
    %c0_i32 = arith.constant 0 : i32
    %c0_i32_0 = arith.constant 0 : i32
    return %arg0, %c0_i32 : i32, i32
  }
  func.func @transform_1(%arg0: i32) -> (i32, i32) {
    %c0_i32 = arith.constant 0 : i32
    %c0_i32_0 = arith.constant 0 : i32
    return %arg0, %c0_i32 : i32, i32
  }
  func.func @transform_2(%arg0: i32) -> (i32, i32) {
    %c0_i32 = arith.constant 0 : i32
    %c0_i32_0 = arith.constant 0 : i32
    %c0_i32_1 = arith.constant 0 : i32
    return %c0_i32, %c0_i32_0 : i32, i32
  }
  func.func @transform_3(%arg0: i32) -> (i32, i32) {
    %c0_i32 = arith.constant 0 : i32
    %c0_i32_0 = arith.constant 0 : i32
    %c0_i32_1 = arith.constant 0 : i32
    return %c0_i32, %c0_i32_0 : i32, i32
  }
  func.func @transform_4(%arg0: i32) -> (i32, i32) {
    %c0_i32 = arith.constant 0 : i32
    %c0_i32_0 = arith.constant 0 : i32
    %c0_i32_1 = arith.constant 0 : i32
    return %c0_i32, %c0_i32_0 : i32, i32
  }
  func.func @transform_5(%arg0: i32) -> (i32, i32) {
    %c0_i32 = arith.constant 0 : i32
    %c0_i32_0 = arith.constant 0 : i32
    return %arg0, %c0_i32 : i32, i32
  }
}

</mosaic_0001>

<bundles_post_ra>
// kernel: tpu_custom_call.1
= control target key start
LH: loop header
LB: loop body
LE: loop exit
PB: predicated region body
PF: predicated region fallthrough
CT: control target
= control target key end

     0   :  { %10 = vsyncpa [#allocation3], 0  ;;  %s2471_s0 = inlined_call_operand.vmem [shape: f32[384,4], index: 0, kind: input, shape index: {}]   ;;  %s2472_s1 = inlined_call_operand.vmem [shape: bf16[64,128], index: 1, kind: input, shape index: {}]   ;;  %s2473_s2 = inlined_call_operand.vmem [shape: bf16[96,16], index: 2, kind: input, shape index: {}]   ;;  %s2474_s3 = inlined_call_operand.vmem [shape: f32[8,128], index: 3, kind: input, shape index: {}]   ;;  %s2475_s4 = inlined_call_operand.vmem [shape: bf16[384,128], index: 4, kind: input, shape index: {}]   ;;  %s2476_s5 = inlined_call_operand.hbm [shape: f32[384,128], index: 5, kind: output, shape index: {}]  }
   0x1   :  { %12 = vsyncpa [#allocation3 + $0x1], 0  ;;  %s1953_s18 = smov 0   ;;  %s1955_s19 = smov 0  }
   0x2   :  { %s1957_s20 = smov 0   ;;  %s1959_s21 = smov 0  }
   0x3 LB: > { %s1974_s22 = sadd.s32 4294967295, %s1913_s21   ;;  %s1513_s23 = sadd.s32 4294967294, %s1913_s21   ;;  %s1913_s21 = sphi %s1959_s21, %s2482_s21   ;;  %s1909_s20 = sphi %s1957_s20, %s2481_s20   ;;  %s1905_s19 = sphi %s1955_s19, %s2480_s19   ;;  %s1901_s18 = sphi %s1953_s18, %s2479_s18  }
   0x4   : > { %s1978_s24 = sadd.s32 1, %s1913_s21   ;;  %s140_s25 = sadd.s32 1, %s1909_s20 }
   0x5   : > { %s137_s26 = ssub.s32 %s1913_s21, %s1978_s24  ;;  %p150_p0 = scmp.ne.s32.totalorder %s1909_s20, %s1905_s19 }
   0x6   : > { %p138_p1 = scmp.eq.s32.totalorder %s137_s26, 0  ;;  %p151_p2 = scmp.eq.s32.totalorder %s1974_s22, 3 }
   0x7   : > { %p156_p3 = scmp.ne.s32.totalorder %s1905_s19, %s1901_s18  ;;  %p157_p4 = scmp.eq.s32.totalorder %s1513_s23, 3 }
   0x8   : > { %s1989_s27 = scalar_select %p138_p1, %s1909_s20, %s140_s25  }
   0x9   : > { %p1991_p5 = por %p151_p2, %p150_p0  ;;  %p1995_p6 = por %p157_p4, %p156_p3 }
   0xa   : > { %p1516_p7 = scmp.ge.s32.totalorder %s1913_s21, 1  ;;  %p202_p8 = scmp.lt.s32.totalorder %s1913_s21, 5 }
   0xc   : > { %p203_p9 = pnand %p1516_p7, %p202_p8 }
   0xd   : > { %s235_s30 = smul.u32 (!%p203_p9), 12, %s1974_s22  ;;  %v1915_v0 = vmov (!%p203_p9), 0   ;;  %s1916_s10 = smov (!%p203_p9), 126   ;;  %v1772_v15 = vld [vmem:[%s2475_s4] sm:$0xff] (!%p203_p9)   ;;  %v1773_v19 = vld [vmem:[%s2475_s4 + $0x8] sm:$0xff] (!%p203_p9)   ;;  %v1917_v20 = vmov (!%p203_p9), 1   ;;  %v382_v46 = vlaneseq (!%p203_p9) }
   0xe   : > { %206 = sbr.rel (%p203_p9) target bundleno = 1432 (0x598), region = 40  ;;  %1754 = vset.pattern.permute.xlu0 (!%p203_p9), %v1915_v0  ;;  %1755 = vset.pattern.permute.xlu1 (!%p203_p9), %v1915_v0  ;;  %v1774_v23 = vld [vmem:[%s2475_s4 + $0x10] sm:$0xff] (!%p203_p9)   ;;  %v1775_v26 = vld [vmem:[%s2475_s4 + $0x18] sm:$0xff] (!%p203_p9)   ;;  %v1776_v30 = vld [vmem:[%s2475_s4 + $0x20] sm:$0xff] (!%p203_p9)   ;;  %s1518_s7 = sshll.u32 (!%p203_p9), %s1974_s22, 1  ;;  %vm1919_vm0 = vmmov (!%p203_p9), 0  }
   0xf   : > { %p236_p10 = scmp.lt.s32.totalorder (!%p203_p9), %s235_s30, 47  ;;  %1605 = vmatprep.subr.bf16.mxu0 (!%p203_p9), %v1772_v15  ;;  %v1777_v33 = vld [vmem:[%s2475_s4 + $0x28] sm:$0xff] (!%p203_p9)   ;;  %v1778_v36 = vld [vmem:[%s2475_s4 + $0x30] sm:$0xff] (!%p203_p9)   ;;  %v1779_v39 = vld [vmem:[%s2475_s4 + $0x38] sm:$0xff] (!%p203_p9)   ;;  %v2063_v47 = vshrl.u32 (!%p203_p9), %v382_v46, 7  ;;  %p242_p11 = scmp.lt.s32.totalorder (!%p203_p9), %s1518_s7, 7 }
  0x10   : > { %1606 = vmatpush3.bf16.msra.mxu0 (!%p203_p9), %v1772_v15  ;;  %v2070_v50 = vld [vmem:[%s2474_s3] sm:$0xff] (!%p203_p9)  ;;  %vm986_vm1 = vcmask (!%p203_p9), 130048   ;;  %s232_s14 = sand.u32 (!%p203_p9), 1, %s1905_s19   ;;  %s1560_s17 = smul.u32 (!%p203_p9), 1536, %s1974_s22 }
  0x11   : > { %1607 = vmatprep.subr.bf16.mxu0 (!%p203_p9), %v1773_v19  ;;  %v448_v48 = vsub.s32 (!%p203_p9), 1, %v2063_v47  ;;  %v384_v49 = vsub.s32 (!%p203_p9), 0, %v2063_v47  ;;  %v476_v55 = vsub.s32 (!%p203_p9), 2, %v2063_v47  ;;  %s2430_s22 = scalar_lea.sflag (!%p203_p9), [#allocation3], %s232_s14 }
  0x13   : > { %v2073_v52 = vrot.slane (!%p203_p9), %v2070_v50, %v448_v48  ;;  %v2076_v53 = vrot.slane (!%p203_p9), %v2070_v50, %v384_v49  ;;  %v2082_v60 = vrot.slane (!%p203_p9), %v2070_v50, %v476_v55 }
  0x14   : > { %1608 = vmatpush3.bf16.msra.mxu0 (!%p203_p9), %v1773_v19 }
  0x15   : > { %s2484_s30 = smov (!%p236_p10, %s235_s30), 47  ;;  %1609 = vmatprep.subr.bf16.mxu0 %v1774_v23  ;;  %s2486_s7 = smov (!%p242_p11, %s1518_s7), 7 }
  0x16   : > { %s1517_s6 = sshll.u32 %s2484_s30, 3  ;;  %s2422_s30 = scalar_lea.hbm %s2476_s5, %s1560_s17 }
  0x17   : > { %s239_s9 = scalar_lea.vmem %s2471_s0, %s1517_s6 }
  0x18   : > { %v250_v1 = vld [vmem:[%s239_s9] sm:$0xff]  ;;  %v252_v2 = vld [vmem:[%s239_s9 + $0x10] sm:$0xff]  ;;  %v251_v3 = vld [vmem:[%s239_s9 + $0x8] sm:$0xff]  ;;  %1610 = vmatpush3.bf16.msra.mxu0 %v1774_v23 }
  0x19   : > { %274 = vrot.lane.b32.xlu0 %v250_v1, %s1916_s10  ;;  %278 = vrot.lane.b32.xlu1 %v252_v2, %s1916_s10  ;;  %v253_v4 = vld [vmem:[%s239_s9 + $0x18] sm:$0xff]  ;;  %v254_v5 = vld [vmem:[%s239_s9 + $0x20] sm:$0xff] }
  0x1a   : > { %v255_v6 = vld [vmem:[%s239_s9 + $0x28] sm:$0xff]  ;;  %v256_v7 = vld [vmem:[%s239_s9 + $0x30] sm:$0xff]  ;;  %v2007_v8 = vld [vmem:[%s239_s9 + $0x38] sm:$0xff]  ;;  %1611 = vmatprep.subr.bf16.mxu0 %v1775_v26 }
  0x1b   : > { %v258_v9 = vld [vmem:[%s239_s9 + $0x40] sm:$0xff]  ;;  %v2009_v10 = vld [vmem:[%s239_s9 + $0x48] sm:$0xff]  ;;  %v2012_v11 = vld [vmem:[%s239_s9 + $0x50] sm:$0xff] }
  0x1c   : > { %v2014_v12 = vld [vmem:[%s239_s9 + $0x58] sm:$0xff]  ;;  %1612 = vmatpush3.bf16.msra.mxu0 %v1775_v26 }
  0x1d   : > { %276 = vrot.lane.b32.xlu0 %v251_v3, %s1916_s10  ;;  %280 = vrot.lane.b32.xlu1 %v253_v4, %s1916_s10 }
  0x1e   : > { %1613 = vmatprep.subr.bf16.mxu0 %v1776_v30 }
  0x20   : > { %1614 = vmatpush3.bf16.msra.mxu0 %v1776_v30 }
  0x21   : > { %282 = vrot.lane.b32.xlu0 %v254_v5, %s1916_s10  ;;  %284 = vrot.lane.b32.xlu1 %v255_v6, %s1916_s10 }
  0x22   : > { %1615 = vmatprep.subr.bf16.mxu0 %v1777_v33 }
  0x24   : > { %1616 = vmatpush3.bf16.msra.mxu0 %v1777_v33 }
  0x25   : > { %286 = vrot.lane.b32.xlu0 %v256_v7, %s1916_s10  ;;  %288 = vrot.lane.b32.xlu1 %v2007_v8, %s1916_s10 }
  0x26   : > { %1617 = vmatprep.subr.bf16.mxu0 %v1778_v36 }
  0x28   : > { %1618 = vmatpush3.bf16.msra.mxu0 %v1778_v36 }
  0x29   : > { %290 = vrot.lane.b32.xlu0 %v258_v9, %s1916_s10  ;;  %292 = vrot.lane.b32.xlu1 %v2009_v10, %s1916_s10 }
  0x2a   : > { %1619 = vmatprep.subr.bf16.mxu0 %v1779_v39 }
  0x2c   : > { %1620 = vmatpush3.bf16.msra.mxu0 %v1779_v39 }
  0x2d   : > { %294 = vrot.lane.b32.xlu0 %v2012_v11, %s1916_s10  ;;  %296 = vrot.lane.b32.xlu1 %v2014_v12, %s1916_s10  ;;  %s1519_s10 = sshll.u32 %s2486_s7, 2  ;;  %s1920_s7 = smov [#allocation2]  }
  0x2e   : > { %s245_s15 = scalar_lea.vmem %s2472_s1, %s1519_s10  ;;  %s1855_s8 = sshll.u32 %s1920_s7, 4  ;;  %s1856_s8 = int_to_ptr.vmem [resolvable:$false] %s1855_s8 }
  0x2f   : > { %s1857_s9 = scalar_lea.vmem %s1856_s8, 3072 }
  0x8b   : > { %v275_v13 = vpop.permute.xlu0 %274  ;;  %v279_v18 = vpop.permute.xlu1 %278 }
  0x8c   : > { %v310_v14 = vsub.f32 %v250_v1, %v275_v13  ;;  %v312_v21 = vsub.f32 %v252_v2, %v279_v18 }
  0x8e   : > { %324 = vperm.xlu0 %1754, %v310_v14  }
  0x8f   : > { %v277_v16 = vpop.permute.xlu0 %276  ;;  %v281_v24 = vpop.permute.xlu1 %280 }
  0x90   : > { %v311_v17 = vsub.f32 %v251_v3, %v277_v16  ;;  %v313_v28 = vsub.f32 %v253_v4, %v281_v24 }
  0x92   : > { %1757 = vset.pattern.permute.xlu0 %v1917_v20  ;;  %329 = vperm.xlu1 %1755, %v311_v17  }
  0x93   : > { %403 = vperm.xlu0 %1757, %v311_v17   ;;  %v283_v22 = vpop.permute.xlu0 %282  ;;  %v285_v27 = vpop.permute.xlu1 %284 }
  0x94   : > { %v314_v25 = vsub.f32 %v254_v5, %v283_v22  ;;  %v315_v29 = vsub.f32 %v255_v6, %v285_v27 }
  0x96   : > { %1756 = vset.pattern.permute.xlu1 %v1917_v20 }
  0x97   : > { %399 = vperm.xlu1 %1756, %v310_v14   ;;  %407 = vperm.xlu0 %1757, %v312_v21   ;;  %v287_v31 = vpop.permute.xlu0 %286  ;;  %v289_v35 = vpop.permute.xlu1 %288 }
  0x98   : > { %v316_v32 = vsub.f32 %v256_v7, %v287_v31  ;;  %v317_v43 = vsub.f32 %v2007_v8, %v289_v35 }
  0x9b   : > { %1758 = vset.pattern.permute.xlu1 %v1915_v0  ;;  %1760 = vset.pattern.permute.xlu0 %v1915_v0  ;;  %v291_v34 = vpop.permute.xlu0 %290  ;;  %v293_v38 = vpop.permute.xlu1 %292 }
  0x9c   : > { %334 = vperm.xlu1 %1758, %v312_v21   ;;  %344 = vperm.xlu0 %1760, %v314_v25   ;;  %v318_v37 = vsub.f32 %v258_v9, %v291_v34  ;;  %v319_v40 = vsub.f32 %v2009_v10, %v293_v38 }
  0x9f   : > { %v295_v41 = vpop.permute.xlu0 %294  ;;  %v297_v44 = vpop.permute.xlu1 %296 }
  0xa0   : > { %339 = vperm.xlu1 %1758, %v313_v28   ;;  %1763 = vset.pattern.permute.xlu0 %v1917_v20  ;;  %v320_v42 = vsub.f32 %v2012_v11, %v295_v41  ;;  %v321_v45 = vsub.f32 %v2014_v12, %v297_v44 }
  0xa1   : > { %419 = vperm.xlu0 %1763, %v315_v29  }
  0xa4   : > { %1759 = vset.pattern.permute.xlu1 %v1917_v20 }
  0xa5   : > { %411 = vperm.xlu1 %1759, %v313_v28   ;;  %423 = vperm.xlu0 %1763, %v316_v32  }
  0xa9   : > { %1761 = vset.pattern.permute.xlu1 %v1915_v0  ;;  %1766 = vset.pattern.permute.xlu0 %v1915_v0 }
  0xaa   : > { %349 = vperm.xlu1 %1761, %v315_v29   ;;  %364 = vperm.xlu0 %1766, %v318_v37  }
  0xae   : > { %1762 = vset.pattern.permute.xlu1 %v1917_v20  ;;  %1769 = vset.pattern.permute.xlu0 %v1917_v20 }
  0xaf   : > { %415 = vperm.xlu1 %1762, %v314_v25   ;;  %435 = vperm.xlu0 %1769, %v319_v40  }
  0xb3   : > { %1764 = vset.pattern.permute.xlu1 %v1915_v0  ;;  %439 = vperm.xlu0 %1769, %v320_v42  }
  0xb4   : > { %354 = vperm.xlu1 %1764, %v316_v32  }
  0xb8   : > { %359 = vperm.xlu1 %1764, %v317_v43  }
  0xbc   : > { %1765 = vset.pattern.permute.xlu1 %v1917_v20 }
  0xbd   : > { %427 = vperm.xlu1 %1765, %v317_v43  }
  0xc1   : > { %1767 = vset.pattern.permute.xlu1 %v1915_v0 }
  0xc2   : > { %369 = vperm.xlu1 %1767, %v319_v40  }
  0xc6   : > { %1768 = vset.pattern.permute.xlu1 %v1917_v20 }
  0xc7   : > { %431 = vperm.xlu1 %1768, %v318_v37  }
  0xcb   : > { %1770 = vset.pattern.permute.xlu1 %v1915_v0 }
  0xcc   : > { %374 = vperm.xlu1 %1770, %v320_v42  }
  0xd0   : > { %379 = vperm.xlu1 %1770, %v321_v45  }
  0xd4   : > { %1771 = vset.pattern.permute.xlu1 %v1917_v20 }
  0xd5   : > { %443 = vperm.xlu1 %1771, %v321_v45  }
 0x10d   : > { %v325_v51 = vpop.permute.xlu0 %324 }
 0x10e   : > { %v386_v62 = vmul.f32 %v2076_v53, %v325_v51 }
 0x111   : > { %v330_v54 = vpop.permute.xlu1 %329 }
 0x112   : > { %v387_v56 = vmul.f32 %v2076_v53, %v330_v54  ;;  %v404_v57 = vpop.permute.xlu0 %403 }
 0x113   : > { %v451_v58 = vmul.f32 %v2073_v52, %v404_v57 }
 0x115   : > { %v463_v59 = vadd.f32 %v451_v58, %v387_v56 }
 0x116   : > { %v400_v61 = vpop.permute.xlu1 %399  ;;  %v408_v4 = vpop.permute.xlu0 %407 }
 0x117   : > { %v450_v63 = vmul.f32 %v2073_v52, %v400_v61  ;;  %v479_v1 = vadd.f32 %v2082_v60, %v463_v59  ;;  %v452_v8 = vmul.f32 %v2073_v52, %v408_v4 }
 0x119   : > { %v462_v0 = vadd.f32 %v450_v63, %v386_v62  ;;  %v491_v6 = vmax.f32 %v479_v1, 0.0 }
 0x11b   : > { %v335_v2 = vpop.permute.xlu1 %334  ;;  %v478_v3 = vadd.f32 %v2082_v60, %v462_v0  ;;  %v345_v11 = vpop.permute.xlu0 %344 }
 0x11c   : > { %v388_v7 = vmul.f32 %v2076_v53, %v335_v2  ;;  %v390_v25 = vmul.f32 %v2076_v53, %v345_v11 }
 0x11d   : > { %v490_v5 = vmax.f32 %v478_v3, 0.0 }
 0x11e   : > { %v464_v12 = vadd.f32 %v452_v8, %v388_v7 }
 0x11f   : > { %v340_v9 = vpop.permute.xlu1 %339  ;;  %v502_v10 = vpack.c.bf16 %v491_v6, %v490_v5 }
 0x120   : > { %v389_v14 = vmul.f32 %v2076_v53, %v340_v9  ;;  %v420_v16 = vpop.permute.xlu0 %419  ;;  %v480_v17 = vadd.f32 %v2082_v60, %v464_v12 }
 0x121   : > { %1621 = vmatprep.mubr.bf16.mxu0 %v502_v10  ;;  %v455_v21 = vmul.f32 %v2073_v52, %v420_v16 }
 0x122   : > { %v492_v23 = vmax.f32 %v480_v17, 0.0 }
 0x124   : > { %v412_v13 = vpop.permute.xlu1 %411  ;;  %v424_v34 = vpop.permute.xlu0 %423 }
 0x125   : > { %v453_v15 = vmul.f32 %v2073_v52, %v412_v13  ;;  %v456_v38 = vmul.f32 %v2073_v52, %v424_v34 }
 0x127   : > { %v465_v18 = vadd.f32 %v453_v15, %v389_v14 }
 0x129   : > { %v481_v19 = vadd.f32 %v2082_v60, %v465_v18  ;;  %v350_v20 = vpop.permute.xlu1 %349  ;;  %v365_v41 = vpop.permute.xlu0 %364 }
 0x12a   : > { %v391_v22 = vmul.f32 %v2076_v53, %v350_v20  ;;  %v394_v59 = vmul.f32 %v2076_v53, %v365_v41 }
 0x12b   : > { %v493_v24 = vmax.f32 %v481_v19, 0.0 }
 0x12c   : > { %v467_v26 = vadd.f32 %v455_v21, %v391_v22  ;;  %v1780_v22 = vld [vmem:[%s2475_s4 + $0x80] sm:$0xff]  }
 0x12d   : > { %v503_v27 = vpack.c.bf16 %v493_v24, %v492_v23  ;;  %v1918_v23 = vmov 0.0   ;;  %v1784_v24 = vld [vmem:[%s2475_s4 + $0xa0] sm:$0xff]  }
 0x12e   : > { %v416_v28 = vpop.permute.xlu1 %415  ;;  %v483_v30 = vadd.f32 %v2082_v60, %v467_v26  ;;  %v436_v46 = vpop.permute.xlu0 %435  ;;  %1633 = vmatprep.subr.bf16.mxu0 %v1918_v23  ;;  %v1786_v26 = vld [vmem:[%s2475_s4 + $0xb0] sm:$0xff]  }
 0x12f   : > { %v454_v29 = vmul.f32 %v2073_v52, %v416_v28  ;;  %1622 = vmatmul.mubr.bf16.vlgmr.msra.gmra.mrb[0].mxu0 %v503_v27  ;;  %v459_v55 = vmul.f32 %v2073_v52, %v436_v46  ;;  %v1787_v27 = vld [vmem:[%s2475_s4 + $0xb8] sm:$0xff]   ;;  %v1788_v28 = vld [vmem:[%s245_s15] sm:$0xff]   ;;  %s1707_s15 = smul.u32 96, %s232_s14 }
 0x130   : > { %v495_v35 = vmax.f32 %v483_v30, 0.0  ;;  %1634 = vmatpush3.bf16.msra.mxu0 %v1780_v22 }
 0x131   : > { %v466_v31 = vadd.f32 %v454_v29, %v390_v25  ;;  %1635 = vmatprep.subr.bf16.mxu0 %v1918_v23  ;;  %v1785_v25 = vld [vmem:[%s2475_s4 + $0xa8] sm:$0xff]   ;;  %s2378_s16 = scalar_lea.vmem [#allocation2], %s1707_s15 }
 0x132   : > { %v440_v5 = vpop.permute.xlu0 %439  ;;  %s1439_s23 = sshll.u32 %s2378_s16, 4  ;;  %s2424_s23 = int_to_ptr.vmem [resolvable:$true] %s1439_s23 }
 0x133   : > { %v482_v32 = vadd.f32 %v2082_v60, %v466_v31  ;;  %v355_v33 = vpop.permute.xlu1 %354  ;;  %v460_v9 = vmul.f32 %v2073_v52, %v440_v5  ;;  %v1791_v5 = vld [vmem:[%s2473_s2 + $0x8] sm:$0xff]   ;;  %s1851_s6 = scalar_lea.vmem %s2424_s23, 1536  ;;  %p1858_p1 = scmp.lt.s32.totalorder %s2424_s23, %s1856_s8 }
 0x134   : > { %v392_v37 = vmul.f32 %v2076_v53, %v355_v33  ;;  %p1852_p12 = scmp.ne.s32.totalorder %s2424_s23, %s1851_s6  ;;  %p1859_p2 = scmp.lt.s32.totalorder %s1857_s9, %s1851_s6 }
 0x135   : > { %v494_v36 = vmax.f32 %v482_v32, 0.0 }
 0x136   : > { %v468_v42 = vadd.f32 %v456_v38, %v392_v37  ;;  %p1853_p13 = pnand %p1852_p12, %p1991_p5  ;;  %p1860_p3 = por %p1859_p2, %p1858_p1 }
 0x137   : > { %v360_v39 = vpop.permute.xlu1 %359  ;;  %v504_v40 = vpack.c.bf16 %v495_v35, %v494_v36 }
 0x138   : > { %v393_v44 = vmul.f32 %v2076_v53, %v360_v39  ;;  %v484_v48 = vadd.f32 %v2082_v60, %v468_v42  ;;  %p1854_p0 = pneg %p1853_p13 }
 0x139   : > { %1625 = vmatprep.mubr.bf16.mxu0 %v504_v40 }
 0x13a   : > { %v496_v57 = vmax.f32 %v484_v48, 0.0  ;;  %p1861_p4 = pnand %p1860_p3, %p1854_p0 }
 0x13c   : > { %v428_v43 = vpop.permute.xlu1 %427 }
 0x13d   : > { %v457_v45 = vmul.f32 %v2073_v52, %v428_v43 }
 0x13f   : > { %v469_v49 = vadd.f32 %v457_v45, %v393_v44 }
 0x141   : > { %v485_v51 = vadd.f32 %v2082_v60, %v469_v49  ;;  %v370_v54 = vpop.permute.xlu1 %369 }
 0x142   : > { %v395_v56 = vmul.f32 %v2076_v53, %v370_v54 }
 0x143   : > { %v497_v58 = vmax.f32 %v485_v51, 0.0 }
 0x144   : > { %v471_v61 = vadd.f32 %v459_v55, %v395_v56 }
 0x145   : > { %v505_v62 = vpack.c.bf16 %v497_v58, %v496_v57 }
 0x146   : > { %v432_v63 = vpop.permute.xlu1 %431  ;;  %v487_v1 = vadd.f32 %v2082_v60, %v471_v61 }
 0x147   : > { %v458_v0 = vmul.f32 %v2073_v52, %v432_v63  ;;  %1626 = vmatmul.mubr.bf16.gmra.mrb[4].mxu0 %v505_v62 }
 0x148   : > { %v499_v6 = vmax.f32 %v487_v1, 0.0 }
 0x149   : > { %v470_v2 = vadd.f32 %v458_v0, %v394_v59 }
 0x14b   : > { %v486_v3 = vadd.f32 %v2082_v60, %v470_v2  ;;  %v375_v4 = vpop.permute.xlu1 %374 }
 0x14c   : > { %v396_v8 = vmul.f32 %v2076_v53, %v375_v4  ;;  %v1790_v4 = vld [vmem:[%s2475_s4 + $0x40] sm:$0xff]  }
 0x14d   : > { %v498_v7 = vmax.f32 %v486_v3, 0.0  ;;  %v1789_v3 = vld [vmem:[%s2473_s2] sm:$0xff]  }
 0x14e   : > { %v472_v12 = vadd.f32 %v460_v9, %v396_v8  ;;  %1655 = vmatprep.mubr.msk.bf16.mxu1 %vm986_vm1, %v1789_v3 }
 0x14f   : > { %v380_v10 = vpop.permute.xlu1 %379  ;;  %v506_v11 = vpack.c.bf16 %v499_v6, %v498_v7  ;;  %v1792_v7 = vld [vmem:[%s2475_s4 + $0x48] sm:$0xff]  }
 0x150   : > { %v397_v14 = vmul.f32 %v2076_v53, %v380_v10  ;;  %v488_v16 = vadd.f32 %v2082_v60, %v472_v12  ;;  %v1782_v53 = vld [vmem:[%s2475_s4 + $0x90] sm:$0xff]  }
 0x151   : > { %1629 = vmatprep.mubr.bf16.mxu0 %v506_v11 }
 0x152   : > { %v500_v19 = vmax.f32 %v488_v16, 0.0 }
 0x154   : > { %v444_v13 = vpop.permute.xlu1 %443 }
 0x155   : > { %v461_v15 = vmul.f32 %v2073_v52, %v444_v13  ;;  %v1781_v52 = vld [vmem:[%s2475_s4 + $0x88] sm:$0xff]   ;;  %v1793_v13 = vld [vmem:[%s2475_s4 + $0x50] sm:$0xff]  }
 0x156   : > { %1636 = vmatpush3.bf16.msra.mxu0 %v1781_v52 }
 0x157   : > { %v473_v17 = vadd.f32 %v461_v15, %v397_v14  ;;  %1637 = vmatprep.subr.bf16.mxu0 %v1918_v23 }
 0x159   : > { %v489_v18 = vadd.f32 %v2082_v60, %v473_v17  ;;  %v1783_v60 = vld [vmem:[%s2475_s4 + $0x98] sm:$0xff]  }
 0x15a   : > { %1638 = vmatpush3.bf16.msra.mxu0 %v1782_v53  ;;  %v1795_v53 = vld [vmem:[%s2473_s2 + $0x10] sm:$0xff]  }
 0x15b   : > { %v501_v20 = vmax.f32 %v489_v18, 0.0  ;;  %1639 = vmatprep.subr.bf16.mxu0 %v1918_v23 }
 0x15d   : > { %v507_v21 = vpack.c.bf16 %v501_v20, %v500_v19 }
 0x15e   : > { %1640 = vmatpush3.bf16.msra.mxu0 %v1783_v60  ;;  %v1796_v60 = vld [vmem:[%s2473_s2 + $0x18] sm:$0xff]  }
 0x15f   : > { %1630 = vmatmul.mubr.bf16.gmra.mrb[8].mxu0 %v507_v21  ;;  %1641 = vmatprep.subr.bf16.mxu0 %v1918_v23  ;;  %v1794_v21 = vld [vmem:[%s2475_s4 + $0x58] sm:$0xff]  }
 0x160   : > { %1649 = vmatprep.mubr.msk.bf16.mxu0 %vm1919_vm0, %v1918_v23 }
 0x162   : > { %1642 = vmatpush3.bf16.msra.mxu0 %v1784_v24  ;;  %v1797_v24 = vld [vmem:[%s2475_s4 + $0x60] sm:$0xff]  }
 0x163   : > { %1643 = vmatprep.subr.bf16.mxu0 %v1918_v23 }
 0x166   : > { %1644 = vmatpush3.bf16.msra.mxu0 %v1785_v25  ;;  %v1798_v25 = vld [vmem:[%s2475_s4 + $0x68] sm:$0xff]  }
 0x167   : > { %1645 = vmatprep.subr.bf16.mxu0 %v1918_v23 }
 0x16a   : > { %1646 = vmatpush3.bf16.msra.mxu0 %v1786_v26  ;;  %v1799_v26 = vld [vmem:[%s2473_s2 + $0x20] sm:$0xff]  }
 0x16b   : > { %1647 = vmatprep.subr.bf16.mxu0 %v1918_v23 }
 0x16e   : > { %1648 = vmatpush3.bf16.msra.mxu0 %v1787_v27  ;;  %v1800_v27 = vld [vmem:[%s2473_s2 + $0x28] sm:$0xff]  }
 0x171   : > { %1650 = vmatmul.mubr.bf16.vlgmr.msra.gmra.mrb[12].mxu0 %v1788_v28  ;;  %v1801_v28 = vld [vmem:[%s2475_s4 + $0x70] sm:$0xff]  }
 0x202   : > { %v1623_v29 = vpop.f32.mrb[0].mxu0 }
 0x203   : > { %v606_v30 = vpop.f32.mrb[1].mxu0 }
 0x204   : > { %653 = vadd.xlane.f32.xlu0 %v606_v30  ;;  %v1624_v31 = vpop.f32.mrb[2].mxu0 }
 0x205   : > { %v609_v32 = vpop.f32.mrb[3].mxu0 }
 0x206   : > { %655 = vadd.xlane.f32.xlu1 %v609_v32 }
 0x208   : > { %657 = vadd.xlane.f32.xlu0 %v1623_v29 }
 0x20c   : > { %659 = vadd.xlane.f32.xlu0 %v1624_v31 }
 0x21a   : > { %v2146_v33 = vpop.f32.mrb[4].mxu0 }
 0x21b   : > { %v622_v34 = vpop.f32.mrb[5].mxu0 }
 0x21c   : > { %661 = vadd.xlane.f32.xlu1 %v622_v34  ;;  %v2148_v35 = vpop.f32.mrb[6].mxu0 }
 0x21d   : > { %v625_v36 = vpop.f32.mrb[7].mxu0 }
 0x21e   : > { %663 = vadd.xlane.f32.xlu0 %v625_v36 }
 0x220   : > { %665 = vadd.xlane.f32.xlu1 %v2146_v33 }
 0x222   : > { %667 = vadd.xlane.f32.xlu0 %v2148_v35 }
 0x232   : > { %v2152_v37 = vpop.f32.mrb[8].mxu0 }
 0x233   : > { %v2154_v38 = vpop.f32.mrb[9].mxu0 }
 0x234   : > { %669 = vadd.xlane.f32.xlu1 %v2154_v38  ;;  %v2157_v39 = vpop.f32.mrb[10].mxu0 }
 0x235   : > { %v2159_v40 = vpop.f32.mrb[11].mxu0 }
 0x236   : > { %671 = vadd.xlane.f32.xlu0 %v2159_v40 }
 0x238   : > { %673 = vadd.xlane.f32.xlu1 %v2152_v37 }
 0x23a   : > { %675 = vadd.xlane.f32.xlu0 %v2157_v39 }
 0x244   : > { %v936_v62 = vpop.f32.mrb[12].mxu0 }
 0x245   : > { %v1651_v63 = vpop.f32.mrb[13].mxu0 }
 0x246   : > { %v939_v0 = vpop.f32.mrb[14].mxu0 }
 0x247   : > { %v955_v1 = vpack.c.bf16 %v939_v0, %v936_v62  ;;  %v1652_v2 = vpop.f32.mrb[15].mxu0 }
 0x248   : > { %v788_v2 = vsub.s32 3, %v2063_v47 }
 0x249   : > { %1653 = vmatprep.subr.bf16.mxu1 %v955_v1 }
 0x24a   : > { %1654 = vmatpush3.bf16.msra.mxu1 %v955_v1 }
 0x24b   : > { %1667 = vmatprep.subr.bf16.mxu1 %v1790_v4 }
 0x24d   : > { %1656 = vmatmul.mubr.msk.bf16.vlgmr.msra.gmra.mrb[0].mxu1 %vm986_vm1, %v1791_v5  ;;  %v2269_v5 = vrot.slane %v2070_v50, %v788_v2 }
 0x24e   : > { %1668 = vmatpush3.bf16.msra.mxu1 %v1790_v4  ;;  %1659 = vmatprep.mubr.msk.bf16.mxu1 %vm986_vm1, %v1795_v53  ;;  %v804_v4 = vsub.s32 4, %v2063_v47 }
 0x24f   : > { %1669 = vmatprep.subr.bf16.mxu1 %v1792_v7 }
 0x252   : > { %1670 = vmatpush3.bf16.msra.mxu1 %v1792_v7 }
 0x253   : > { %1671 = vmatprep.subr.bf16.mxu1 %v1793_v13 }
 0x255   : > { %1660 = vmatmul.mubr.msk.bf16.gmra.mrb[4].mxu1 %vm986_vm1, %v1796_v60 }
 0x256   : > { %1672 = vmatpush3.bf16.msra.mxu1 %v1793_v13  ;;  %1663 = vmatprep.mubr.msk.bf16.mxu1 %vm986_vm1, %v1799_v26 }
 0x257   : > { %1673 = vmatprep.subr.bf16.mxu1 %v1794_v21 }
 0x25a   : > { %1674 = vmatpush3.bf16.msra.mxu1 %v1794_v21 }
 0x25b   : > { %1675 = vmatprep.subr.bf16.mxu1 %v1797_v24 }
 0x25d   : > { %1664 = vmatmul.mubr.msk.bf16.gmra.mrb[8].mxu1 %vm986_vm1, %v1800_v27 }
 0x25e   : > { %1676 = vmatpush3.bf16.msra.mxu1 %v1797_v24 }
 0x25f   : > { %1677 = vmatprep.subr.bf16.mxu1 %v1798_v25 }
 0x262   : > { %1678 = vmatpush3.bf16.msra.mxu1 %v1798_v25 }
 0x263   : > { %1679 = vmatprep.subr.bf16.mxu1 %v1801_v28 }
 0x266   : > { %1680 = vmatpush3.bf16.msra.mxu1 %v1801_v28 }
 0x291   : > { %v654_v41 = vpop.xlane.xlu0 %653 }
 0x292   : > { %v678_v42 = vmul.f32 0.0078125, %v654_v41 }
 0x293   : > { %v656_v43 = vpop.xlane.xlu1 %655 }
 0x294   : > { %v2164_v44 = vsub.f32 %v606_v30, %v678_v42  ;;  %v679_v45 = vmul.f32 0.0078125, %v656_v43  ;;  %v1802_v30 = vld [vmem:[%s2475_s4 + $0x78] sm:$0xff]  }
 0x295   : > { %v658_v46 = vpop.xlane.xlu0 %657  ;;  %1681 = vmatprep.subr.bf16.mxu1 %v1802_v30 }
 0x296   : > { %v2166_v48 = vsub.f32 %v609_v32, %v679_v45  ;;  %v680_v49 = vmul.f32 0.0078125, %v658_v46  ;;  %v702_v51 = vmul.f32 %v2164_v44, %v2164_v44  ;;  %1682 = vmatpush3.bf16.msra.mxu1 %v1802_v30 }
 0x298   : > { %v2170_v54 = vsub.f32 %v1623_v29, %v680_v49  ;;  %714 = vadd.xlane.f32.xlu1 %v702_v51  ;;  %v703_v55 = vmul.f32 %v2166_v48, %v2166_v48 }
 0x299   : > { %v660_v56 = vpop.xlane.xlu0 %659 }
 0x29a   : > { %v681_v57 = vmul.f32 0.0078125, %v660_v56  ;;  %716 = vadd.xlane.f32.xlu0 %v703_v55  ;;  %v704_v58 = vmul.f32 %v2170_v54, %v2170_v54 }
 0x29c   : > { %v2176_v59 = vsub.f32 %v1624_v31, %v681_v57  ;;  %718 = vadd.xlane.f32.xlu1 %v704_v58 }
 0x29e   : > { %v705_v61 = vmul.f32 %v2176_v59, %v2176_v59 }
 0x2a0   : > { %720 = vadd.xlane.f32.xlu0 %v705_v61 }
 0x2a9   : > { %v662_v6 = vpop.xlane.xlu1 %661 }
 0x2aa   : > { %v682_v8 = vmul.f32 0.0078125, %v662_v6 }
 0x2ab   : > { %v664_v9 = vpop.xlane.xlu0 %663 }
 0x2ac   : > { %v2194_v10 = vsub.f32 %v622_v34, %v682_v8  ;;  %v683_v11 = vmul.f32 0.0078125, %v664_v9  ;;  %v2273_v8 = vrot.slane %v2070_v50, %v804_v4 }
 0x2ad   : > { %v666_v12 = vpop.xlane.xlu1 %665 }
 0x2ae   : > { %v2199_v14 = vsub.f32 %v625_v36, %v683_v11  ;;  %v684_v15 = vmul.f32 0.0078125, %v666_v12  ;;  %v706_v16 = vmul.f32 %v2194_v10, %v2194_v10 }
 0x2af   : > { %v668_v17 = vpop.xlane.xlu0 %667 }
 0x2b0   : > { %v2204_v18 = vsub.f32 %v2146_v33, %v684_v15  ;;  %v685_v19 = vmul.f32 0.0078125, %v668_v17  ;;  %722 = vadd.xlane.f32.xlu1 %v706_v16  ;;  %v707_v20 = vmul.f32 %v2199_v14, %v2199_v14 }
 0x2b2   : > { %v2212_v22 = vsub.f32 %v2148_v35, %v685_v19  ;;  %724 = vadd.xlane.f32.xlu0 %v707_v20  ;;  %v708_v23 = vmul.f32 %v2204_v18, %v2204_v18 }
 0x2b4   : > { %726 = vadd.xlane.f32.xlu1 %v708_v23  ;;  %v709_v52 = vmul.f32 %v2212_v22, %v2212_v22 }
 0x2b6   : > { %728 = vadd.xlane.f32.xlu0 %v709_v52 }
 0x2c1   : > { %v670_v29 = vpop.xlane.xlu1 %669 }
 0x2c2   : > { %v686_v31 = vmul.f32 0.0078125, %v670_v29 }
 0x2c3   : > { %v672_v32 = vpop.xlane.xlu0 %671 }
 0x2c4   : > { %v2247_v33 = vsub.f32 %v2154_v38, %v686_v31  ;;  %v687_v34 = vmul.f32 0.0078125, %v672_v32 }
 0x2c5   : > { %v674_v35 = vpop.xlane.xlu1 %673 }
 0x2c6   : > { %v2250_v36 = vsub.f32 %v2159_v40, %v687_v34  ;;  %v688_v41 = vmul.f32 0.0078125, %v674_v35  ;;  %v710_v42 = vmul.f32 %v2247_v33, %v2247_v33 }
 0x2c7   : > { %v676_v43 = vpop.xlane.xlu0 %675 }
 0x2c8   : > { %v2255_v45 = vsub.f32 %v2152_v37, %v688_v41  ;;  %v689_v46 = vmul.f32 0.0078125, %v676_v43  ;;  %730 = vadd.xlane.f32.xlu1 %v710_v42  ;;  %v711_v38 = vmul.f32 %v2250_v36, %v2250_v36 }
 0x2ca   : > { %v2260_v49 = vsub.f32 %v2157_v39, %v689_v46  ;;  %732 = vadd.xlane.f32.xlu0 %v711_v38  ;;  %v712_v40 = vmul.f32 %v2255_v45, %v2255_v45 }
 0x2cc   : > { %734 = vadd.xlane.f32.xlu1 %v712_v40  ;;  %v713_v51 = vmul.f32 %v2260_v49, %v2260_v49 }
 0x2ce   : > { %736 = vadd.xlane.f32.xlu0 %v713_v51 }
 0x325   : > { %v715_v55 = vpop.xlane.xlu1 %714 }
 0x326   : > { %v738_v37 = vmul.f32 0.0078125, %v715_v55 }
 0x327   : > { %v717_v56 = vpop.xlane.xlu0 %716 }
 0x328   : > { %v750_v57 = vadd.f32 1e-05, %v738_v37  ;;  %v739_v58 = vmul.f32 0.0078125, %v717_v56 }
 0x329   : > { %v719_v61 = vpop.xlane.xlu1 %718 }
 0x32a   : > { %1803 = vrsqrt.f32 %v750_v57  ;;  %v751_v62 = vadd.f32 1e-05, %v739_v58  ;;  %v740_v63 = vmul.f32 0.0078125, %v719_v61 }
 0x32c   : > { %1805 = vrsqrt.f32 %v751_v62  ;;  %v752_v39 = vadd.f32 1e-05, %v740_v63 }
 0x32d   : > { %v721_v0 = vpop.xlane.xlu0 %720 }
 0x32e   : > { %1807 = vrsqrt.f32 %v752_v39  ;;  %v741_v1 = vmul.f32 0.0078125, %v721_v0 }
 0x330   : > { %v753_v3 = vadd.f32 1e-05, %v741_v1 }
 0x332   : > { %1809 = vrsqrt.f32 %v753_v3 }
 0x334   : > { %v1804_v6 = vpop.eup %1803 }
 0x335   : > { %v774_v7 = vmul.f32 %v1804_v6, %v2164_v44 }
 0x336   : > { %v1806_v9 = vpop.eup %1805 }
 0x337   : > { %v775_v11 = vmul.f32 %v1806_v9, %v2166_v48  ;;  %v790_v12 = vmul.f32 %v2269_v5, %v774_v7 }
 0x338   : > { %v1808_v13 = vpop.eup %1807 }
 0x339   : > { %v776_v15 = vmul.f32 %v1808_v13, %v2170_v54  ;;  %v791_v16 = vmul.f32 %v2269_v5, %v775_v11  ;;  %v806_v17 = vadd.f32 %v2273_v8, %v790_v12 }
 0x33b   : > { %v792_v19 = vmul.f32 %v2269_v5, %v776_v15  ;;  %v807_v20 = vadd.f32 %v2273_v8, %v791_v16  ;;  %v818_v52 = vmax.f32 %v806_v17, 0.0 }
 0x33c   : > { %v1810_v44 = vpop.eup %1809 }
 0x33d   : > { %v777_v21 = vmul.f32 %v1810_v44, %v2176_v59  ;;  %v723_v23 = vpop.xlane.xlu1 %722  ;;  %v819_v53 = vmax.f32 %v807_v20, 0.0  ;;  %v808_v54 = vadd.f32 %v2273_v8, %v792_v19 }
 0x33e   : > { %v742_v48 = vmul.f32 0.0078125, %v723_v23 }
 0x33f   : > { %v793_v60 = vmul.f32 %v2269_v5, %v777_v21  ;;  %v725_v24 = vpop.xlane.xlu0 %724  ;;  %v1086_v25 = vpack.c.bf16 %v819_v53, %v818_v52  ;;  %v820_v32 = vmax.f32 %v808_v54, 0.0 }
 0x340   : > { %v754_v26 = vadd.f32 1e-05, %v742_v48  ;;  %v743_v27 = vmul.f32 0.0078125, %v725_v24 }
 0x341   : > { %v727_v28 = vpop.xlane.xlu1 %726  ;;  %1683 = vmatprep.mubr.bf16.mxu1 %v1086_v25  ;;  %v809_v29 = vadd.f32 %v2273_v8, %v793_v60 }
 0x342   : > { %1811 = vrsqrt.f32 %v754_v26  ;;  %v755_v30 = vadd.f32 1e-05, %v743_v27  ;;  %v744_v31 = vmul.f32 0.0078125, %v727_v28 }
 0x343   : > { %v729_v59 = vpop.xlane.xlu0 %728  ;;  %v821_v34 = vmax.f32 %v809_v29, 0.0 }
 0x344   : > { %1813 = vrsqrt.f32 %v755_v30  ;;  %v756_v35 = vadd.f32 1e-05, %v744_v31  ;;  %v745_v41 = vmul.f32 0.0078125, %v729_v59 }
 0x345   : > { %v1087_v42 = vpack.c.bf16 %v821_v34, %v820_v32 }
 0x346   : > { %1815 = vrsqrt.f32 %v756_v35  ;;  %v757_v43 = vadd.f32 1e-05, %v745_v41 }
 0x347   : > { %1684 = vmatmul.mubr.bf16.vlgmr.msra.gmra.mrb[0].mxu1 %v1087_v42 }
 0x348   : > { %1817 = vrsqrt.f32 %v757_v43 }
 0x34c   : > { %v1812_v46 = vpop.eup %1811 }
 0x34d   : > { %v778_v38 = vmul.f32 %v1812_v46, %v2194_v10 }
 0x34e   : > { %v1814_v40 = vpop.eup %1813 }
 0x34f   : > { %v779_v51 = vmul.f32 %v1814_v40, %v2199_v14  ;;  %v794_v55 = vmul.f32 %v2269_v5, %v778_v38 }
 0x350   : > { %v1816_v37 = vpop.eup %1815 }
 0x351   : > { %v795_v56 = vmul.f32 %v2269_v5, %v779_v51  ;;  %v810_v57 = vadd.f32 %v2273_v8, %v794_v55  ;;  %v780_v58 = vmul.f32 %v1816_v37, %v2204_v18 }
 0x352   : > { %v1818_v61 = vpop.eup %1817 }
 0x353   : > { %v811_v62 = vadd.f32 %v2273_v8, %v795_v56  ;;  %v781_v63 = vmul.f32 %v1818_v61, %v2212_v22  ;;  %v796_v39 = vmul.f32 %v2269_v5, %v780_v58  ;;  %v822_v0 = vmax.f32 %v810_v57, 0.0 }
 0x355   : > { %v731_v10 = vpop.xlane.xlu1 %730  ;;  %v823_v1 = vmax.f32 %v811_v62, 0.0  ;;  %v797_v14 = vmul.f32 %v2269_v5, %v781_v63  ;;  %v812_v2 = vadd.f32 %v2273_v8, %v796_v39 }
 0x356   : > { %v746_v3 = vmul.f32 0.0078125, %v731_v10 }
 0x357   : > { %v733_v4 = vpop.xlane.xlu0 %732  ;;  %v1088_v6 = vpack.c.bf16 %v823_v1, %v822_v0  ;;  %v813_v7 = vadd.f32 %v2273_v8, %v797_v14  ;;  %v824_v12 = vmax.f32 %v812_v2, 0.0 }
 0x358   : > { %v758_v18 = vadd.f32 1e-05, %v746_v3  ;;  %v747_v9 = vmul.f32 0.0078125, %v733_v4 }
 0x359   : > { %v735_v11 = vpop.xlane.xlu1 %734  ;;  %1687 = vmatprep.mubr.bf16.mxu1 %v1088_v6  ;;  %v825_v22 = vmax.f32 %v813_v7, 0.0 }
 0x35a   : > { %1819 = vrsqrt.f32 %v758_v18  ;;  %v759_v13 = vadd.f32 1e-05, %v747_v9  ;;  %v748_v15 = vmul.f32 0.0078125, %v735_v11 }
 0x35b   : > { %v737_v16 = vpop.xlane.xlu0 %736  ;;  %v1089_v17 = vpack.c.bf16 %v825_v22, %v824_v12 }
 0x35c   : > { %1821 = vrsqrt.f32 %v759_v13  ;;  %v760_v19 = vadd.f32 1e-05, %v748_v15  ;;  %v749_v20 = vmul.f32 0.0078125, %v737_v16 }
 0x35d   : > { %1688 = vmatmul.mubr.bf16.gmra.mrb[4].mxu1 %v1089_v17 }
 0x35e   : > { %1823 = vrsqrt.f32 %v760_v19  ;;  %v761_v44 = vadd.f32 1e-05, %v749_v20 }
 0x360   : > { %1825 = vrsqrt.f32 %v761_v44 }
 0x364   : > { %v1820_v21 = vpop.eup %1819 }
 0x365   : > { %v782_v23 = vmul.f32 %v1820_v21, %v2247_v33 }
 0x366   : > { %v1822_v52 = vpop.eup %1821 }
 0x367   : > { %v783_v53 = vmul.f32 %v1822_v52, %v2250_v36  ;;  %v798_v48 = vmul.f32 %v2269_v5, %v782_v23 }
 0x368   : > { %v1824_v60 = vpop.eup %1823 }
 0x369   : > { %v799_v24 = vmul.f32 %v2269_v5, %v783_v53  ;;  %v814_v25 = vadd.f32 %v2273_v8, %v798_v48  ;;  %v784_v54 = vmul.f32 %v1824_v60, %v2255_v45 }
 0x36a   : > { %v1826_v26 = vpop.eup %1825 }
 0x36b   : > { %v815_v27 = vadd.f32 %v2273_v8, %v799_v24  ;;  %v785_v28 = vmul.f32 %v1826_v26, %v2260_v49  ;;  %v800_v29 = vmul.f32 %v2269_v5, %v784_v54  ;;  %v826_v33 = vmax.f32 %v814_v25, 0.0 }
 0x36d   : > { %v827_v30 = vmax.f32 %v815_v27, 0.0  ;;  %v801_v36 = vmul.f32 %v2269_v5, %v785_v28  ;;  %v816_v31 = vadd.f32 %v2273_v8, %v800_v29 }
 0x36f   : > { %v1090_v59 = vpack.c.bf16 %v827_v30, %v826_v33  ;;  %v817_v32 = vadd.f32 %v2273_v8, %v801_v36  ;;  %v828_v34 = vmax.f32 %v816_v31, 0.0 }
 0x371   : > { %1691 = vmatprep.mubr.bf16.mxu1 %v1090_v59  ;;  %v829_v35 = vmax.f32 %v817_v32, 0.0 }
 0x373   : > { %v1091_v45 = vpack.c.bf16 %v829_v35, %v828_v34 }
 0x375   : > { %1692 = vmatmul.mubr.bf16.gmra.mrb[8].mxu1 %v1091_v45 }
 0x41a   : > { %v1685_v41 = vpop.f32.mrb[0].mxu1 }
 0x41b   : > { %1241 = vadd.xlane.f32.xlu1 %v1685_v41  ;;  %v1190_v42 = vpop.f32.mrb[1].mxu1 }
 0x41c   : > { %v1686_v49 = vpop.f32.mrb[2].mxu1 }
 0x41d   : > { %1243 = vadd.xlane.f32.xlu0 %v1686_v49  ;;  %v1193_v43 = vpop.f32.mrb[3].mxu1 }
 0x41f   : > { %1237 = vadd.xlane.f32.xlu1 %v1190_v42 }
 0x421   : > { %1239 = vadd.xlane.f32.xlu0 %v1193_v43 }
 0x430   : > { %v1689_v46 = vpop.f32.mrb[4].mxu1 }
 0x431   : > { %1249 = vadd.xlane.f32.xlu1 %v1689_v46  ;;  %v1206_v5 = vpop.f32.mrb[5].mxu1 }
 0x432   : > { %v1690_v38 = vpop.f32.mrb[6].mxu1 }
 0x433   : > { %1251 = vadd.xlane.f32.xlu0 %v1690_v38  ;;  %v1209_v40 = vpop.f32.mrb[7].mxu1 }
 0x435   : > { %1245 = vadd.xlane.f32.xlu1 %v1206_v5 }
 0x437   : > { %1247 = vadd.xlane.f32.xlu0 %v1209_v40 }
 0x448   : > { %v1693_v8 = vpop.f32.mrb[8].mxu1 }
 0x449   : > { %v1222_v51 = vpop.f32.mrb[9].mxu1 }
 0x44a   : > { %1253 = vadd.xlane.f32.xlu1 %v1222_v51  ;;  %v1694_v55 = vpop.f32.mrb[10].mxu1 }
 0x44b   : > { %v1225_v37 = vpop.f32.mrb[11].mxu1 }
 0x44c   : > { %1255 = vadd.xlane.f32.xlu0 %v1225_v37 }
 0x44e   : > { %1257 = vadd.xlane.f32.xlu1 %v1693_v8 }
 0x450   : > { %1259 = vadd.xlane.f32.xlu0 %v1694_v55 }
 0x4a8   : > { %v1242_v56 = vpop.xlane.xlu1 %1241 }
 0x4a9   : > { %v1263_v57 = vmul.f32 0.0078125, %v1242_v56 }
 0x4aa   : > { %v1244_v58 = vpop.xlane.xlu0 %1243 }
 0x4ab   : > { %v2310_v61 = vsub.f32 %v1685_v41, %v1263_v57  ;;  %v1264_v62 = vmul.f32 0.0078125, %v1244_v58 }
 0x4ac   : > { %v1238_v63 = vpop.xlane.xlu1 %1237 }
 0x4ad   : > { %v2312_v39 = vsub.f32 %v1686_v49, %v1264_v62  ;;  %v1261_v10 = vmul.f32 0.0078125, %v1238_v63  ;;  %v1287_v0 = vmul.f32 %v2310_v61, %v2310_v61 }
 0x4ae   : > { %v1240_v1 = vpop.xlane.xlu0 %1239 }
 0x4af   : > { %v2316_v14 = vsub.f32 %v1190_v42, %v1261_v10  ;;  %v1262_v2 = vmul.f32 0.0078125, %v1240_v1  ;;  %1301 = vadd.xlane.f32.xlu1 %v1287_v0  ;;  %v1288_v3 = vmul.f32 %v2312_v39, %v2312_v39 }
 0x4b1   : > { %v2320_v4 = vsub.f32 %v1193_v43, %v1262_v2  ;;  %1303 = vadd.xlane.f32.xlu0 %v1288_v3  ;;  %v1285_v6 = vmul.f32 %v2316_v14, %v2316_v14 }
 0x4b3   : > { %1297 = vadd.xlane.f32.xlu1 %v1285_v6  ;;  %v1286_v7 = vmul.f32 %v2320_v4, %v2320_v4 }
 0x4b5   : > { %1299 = vadd.xlane.f32.xlu0 %v1286_v7 }
 0x4be   : > { %v1250_v18 = vpop.xlane.xlu1 %1249 }
 0x4bf   : > { %v1267_v9 = vmul.f32 0.0078125, %v1250_v18 }
 0x4c0   : > { %v1252_v11 = vpop.xlane.xlu0 %1251 }
 0x4c1   : > { %v2326_v12 = vsub.f32 %v1689_v46, %v1267_v9  ;;  %v1268_v22 = vmul.f32 0.0078125, %v1252_v11 }
 0x4c2   : > { %v1246_v13 = vpop.xlane.xlu1 %1245 }
 0x4c3   : > { %v2328_v15 = vsub.f32 %v1690_v38, %v1268_v22  ;;  %v1265_v16 = vmul.f32 0.0078125, %v1246_v13  ;;  %v1291_v17 = vmul.f32 %v2326_v12, %v2326_v12 }
 0x4c4   : > { %v1248_v19 = vpop.xlane.xlu0 %1247 }
 0x4c5   : > { %v2332_v20 = vsub.f32 %v1206_v5, %v1265_v16  ;;  %v1266_v44 = vmul.f32 0.0078125, %v1248_v19  ;;  %1309 = vadd.xlane.f32.xlu1 %v1291_v17  ;;  %v1292_v21 = vmul.f32 %v2328_v15, %v2328_v15 }
 0x4c7   : > { %v2336_v23 = vsub.f32 %v1209_v40, %v1266_v44  ;;  %1311 = vadd.xlane.f32.xlu0 %v1292_v21  ;;  %v1289_v52 = vmul.f32 %v2332_v20, %v2332_v20 }
 0x4c9   : > { %1305 = vadd.xlane.f32.xlu1 %v1289_v52  ;;  %v1290_v53 = vmul.f32 %v2336_v23, %v2336_v23 }
 0x4cb   : > { %1307 = vadd.xlane.f32.xlu0 %v1290_v53 }
 0x4d7   : > { %v1254_v48 = vpop.xlane.xlu1 %1253 }
 0x4d8   : > { %v1269_v60 = vmul.f32 0.0078125, %v1254_v48 }
 0x4d9   : > { %v1256_v24 = vpop.xlane.xlu0 %1255 }
 0x4da   : > { %v2342_v25 = vsub.f32 %v1222_v51, %v1269_v60  ;;  %v1270_v54 = vmul.f32 0.0078125, %v1256_v24 }
 0x4db   : > { %v1258_v26 = vpop.xlane.xlu1 %1257 }
 0x4dc   : > { %v2344_v27 = vsub.f32 %v1225_v37, %v1270_v54  ;;  %v1271_v28 = vmul.f32 0.0078125, %v1258_v26  ;;  %v1293_v29 = vmul.f32 %v2342_v25, %v2342_v25  ;;  %v1387_v37 = vsub.s32 6, %v2063_v47 }
 0x4dd   : > { %v1260_v33 = vpop.xlane.xlu0 %1259 }
 0x4de   : > { %v2348_v30 = vsub.f32 %v1693_v8, %v1271_v28  ;;  %v1272_v36 = vmul.f32 0.0078125, %v1260_v33  ;;  %1313 = vadd.xlane.f32.xlu1 %v1293_v29  ;;  %v1294_v31 = vmul.f32 %v2344_v27, %v2344_v27  ;;  %v2365_v58 = vrot.slane %v2070_v50, %v1387_v37 }
 0x4e0   : > { %v2352_v59 = vsub.f32 %v1694_v55, %v1272_v36  ;;  %1315 = vadd.xlane.f32.xlu0 %v1294_v31  ;;  %v1295_v32 = vmul.f32 %v2348_v30, %v2348_v30  ;;  %v1371_v55 = vsub.s32 5, %v2063_v47 }
 0x4e2   : > { %1317 = vadd.xlane.f32.xlu1 %v1295_v32  ;;  %v1296_v34 = vmul.f32 %v2352_v59, %v2352_v59  ;;  %v2361_v56 = vrot.slane %v2070_v50, %v1371_v55 }
 0x4e4   : > { %1319 = vadd.xlane.f32.xlu0 %v1296_v34 }
 0x53c   : > { %v1302_v35 = vpop.xlane.xlu1 %1301 }
 0x53d   : > { %v1323_v45 = vmul.f32 0.0078125, %v1302_v35 }
 0x53e   : > { %v1304_v41 = vpop.xlane.xlu0 %1303 }
 0x53f   : > { %v1335_v42 = vadd.f32 1e-05, %v1323_v45  ;;  %v1324_v49 = vmul.f32 0.0078125, %v1304_v41 }
 0x540   : > { %v1298_v43 = vpop.xlane.xlu1 %1297 }
 0x541   : > { %1827 = vrsqrt.f32 %v1335_v42  ;;  %v1336_v46 = vadd.f32 1e-05, %v1324_v49  ;;  %v1321_v5 = vmul.f32 0.0078125, %v1298_v43 }
 0x542   : > { %v1300_v38 = vpop.xlane.xlu0 %1299 }
 0x543   : > { %1829 = vrsqrt.f32 %v1336_v46  ;;  %v1333_v40 = vadd.f32 1e-05, %v1321_v5  ;;  %v1322_v8 = vmul.f32 0.0078125, %v1300_v38 }
 0x545   : > { %1831 = vrsqrt.f32 %v1333_v40  ;;  %v1334_v51 = vadd.f32 1e-05, %v1322_v8 }
 0x547   : > { %1833 = vrsqrt.f32 %v1334_v51 }
 0x54b   : > { %v1828_v57 = vpop.eup %1827 }
 0x54c   : > { %v1359_v62 = vmul.f32 %v1828_v57, %v2310_v61 }
 0x54d   : > { %v1830_v63 = vpop.eup %1829 }
 0x54e   : > { %v1375_v10 = vmul.f32 %v2361_v56, %v1359_v62  ;;  %v1360_v0 = vmul.f32 %v1830_v63, %v2312_v39 }
 0x54f   : > { %v1832_v1 = vpop.eup %1831 }
 0x550   : > { %v1391_v47 = vadd.f32 %v2365_v58, %v1375_v10  ;;  %v1376_v2 = vmul.f32 %v2361_v56, %v1360_v0  ;;  %v1357_v3 = vmul.f32 %v1832_v1, %v2316_v14 }
 0x551   : > { %v1834_v6 = vpop.eup %1833 }
 0x552   : > { %v1403_v7 = vmax.f32 %v1391_v47, 0.0  ;;  %v1392_v50 = vadd.f32 %v2365_v58, %v1376_v2  ;;  %v1373_v61 = vmul.f32 %v2361_v56, %v1357_v3  ;;  %v1358_v18 = vmul.f32 %v1834_v6, %v2320_v4  ;;  %v1310_v9 = vpop.xlane.xlu1 %1309 }
 0x553   : > { %v1327_v11 = vmul.f32 0.0078125, %v1310_v9 }
 0x554   : > { %1415 = vst [vmem:[%s2378_s16 + $0x10] sm:$0xff] %v1403_v7  ;;  %v1404_v39 = vmax.f32 %v1392_v50, 0.0  ;;  %v1389_v22 = vadd.f32 %v2365_v58, %v1373_v61  ;;  %v1374_v14 = vmul.f32 %v2361_v56, %v1358_v18  ;;  %v1312_v13 = vpop.xlane.xlu0 %1311 }
 0x555   : > { %v1339_v16 = vadd.f32 1e-05, %v1327_v11  ;;  %v1328_v17 = vmul.f32 0.0078125, %v1312_v13 }
 0x556   : > { %1416 = vst [vmem:[%s2378_s16 + $0x18] sm:$0xff] %v1404_v39  ;;  %v1401_v19 = vmax.f32 %v1389_v22, 0.0  ;;  %v1390_v4 = vadd.f32 %v2365_v58, %v1374_v14  ;;  %v1306_v44 = vpop.xlane.xlu1 %1305 }
 0x557   : > { %1835 = vrsqrt.f32 %v1339_v16  ;;  %v1340_v21 = vadd.f32 1e-05, %v1328_v17  ;;  %v1325_v52 = vmul.f32 0.0078125, %v1306_v44 }
 0x558   : > { %1413 = vst [vmem:[%s2378_s16] sm:$0xff] %v1401_v19  ;;  %v1402_v53 = vmax.f32 %v1390_v4, 0.0  ;;  %v1308_v48 = vpop.xlane.xlu0 %1307 }
 0x559   : > { %1837 = vrsqrt.f32 %v1340_v21  ;;  %v1337_v60 = vadd.f32 1e-05, %v1325_v52  ;;  %v1326_v24 = vmul.f32 0.0078125, %v1308_v48 }
 0x55a   : > { %1414 = vst [vmem:[%s2378_s16 + $0x8] sm:$0xff] %v1402_v53 }
 0x55b   : > { %1839 = vrsqrt.f32 %v1337_v60  ;;  %v1338_v54 = vadd.f32 1e-05, %v1326_v24 }
 0x55d   : > { %1841 = vrsqrt.f32 %v1338_v54 }
 0x561   : > { %v1836_v26 = vpop.eup %1835 }
 0x562   : > { %v1363_v28 = vmul.f32 %v1836_v26, %v2326_v12 }
 0x563   : > { %v1838_v29 = vpop.eup %1837 }
 0x564   : > { %v1379_v33 = vmul.f32 %v2361_v56, %v1363_v28  ;;  %v1364_v36 = vmul.f32 %v1838_v29, %v2328_v15 }
 0x565   : > { %v1840_v31 = vpop.eup %1839 }
 0x566   : > { %v1395_v32 = vadd.f32 %v2365_v58, %v1379_v33  ;;  %v1380_v34 = vmul.f32 %v2361_v56, %v1364_v36  ;;  %v1361_v35 = vmul.f32 %v1840_v31, %v2332_v20 }
 0x567   : > { %v1842_v45 = vpop.eup %1841 }
 0x568   : > { %v1407_v41 = vmax.f32 %v1395_v32, 0.0  ;;  %v1396_v42 = vadd.f32 %v2365_v58, %v1380_v34  ;;  %v1377_v12 = vmul.f32 %v2361_v56, %v1361_v35  ;;  %v1362_v49 = vmul.f32 %v1842_v45, %v2336_v23 }
 0x56a   : > { %1419 = vst [vmem:[%s2378_s16 + $0x30] sm:$0xff] %v1407_v41  ;;  %v1408_v43 = vmax.f32 %v1396_v42, 0.0  ;;  %v1393_v15 = vadd.f32 %v2365_v58, %v1377_v12  ;;  %v1378_v46 = vmul.f32 %v2361_v56, %v1362_v49 }
 0x56b   : > { %v1314_v5 = vpop.xlane.xlu1 %1313 }
 0x56c   : > { %1420 = vst [vmem:[%s2378_s16 + $0x38] sm:$0xff] %v1408_v43  ;;  %v1405_v38 = vmax.f32 %v1393_v15, 0.0  ;;  %v1394_v20 = vadd.f32 %v2365_v58, %v1378_v46  ;;  %v1329_v40 = vmul.f32 0.0078125, %v1314_v5 }
 0x56d   : > { %v1316_v8 = vpop.xlane.xlu0 %1315 }
 0x56e   : > { %1417 = vst [vmem:[%s2378_s16 + $0x20] sm:$0xff] %v1405_v38  ;;  %v1406_v51 = vmax.f32 %v1394_v20, 0.0  ;;  %v1341_v55 = vadd.f32 1e-05, %v1329_v40  ;;  %v1330_v37 = vmul.f32 0.0078125, %v1316_v8 }
 0x56f   : > { %v1318_v57 = vpop.xlane.xlu1 %1317 }
 0x570   : > { %1418 = vst [vmem:[%s2378_s16 + $0x28] sm:$0xff] %v1406_v51  ;;  %1843 = vrsqrt.f32 %v1341_v55  ;;  %v1342_v23 = vadd.f32 1e-05, %v1330_v37  ;;  %v1331_v62 = vmul.f32 0.0078125, %v1318_v57 }
 0x571   : > { %v1320_v63 = vpop.xlane.xlu0 %1319 }
 0x572   : > { %1845 = vrsqrt.f32 %v1342_v23  ;;  %v1343_v10 = vadd.f32 1e-05, %v1331_v62  ;;  %v1332_v0 = vmul.f32 0.0078125, %v1320_v63 }
 0x574   : > { %1847 = vrsqrt.f32 %v1343_v10  ;;  %v1344_v1 = vadd.f32 1e-05, %v1332_v0 }
 0x576   : > { %1849 = vrsqrt.f32 %v1344_v1 }
 0x57a   : > { %v1844_v47 = vpop.eup %1843 }
 0x57b   : > { %v1365_v2 = vmul.f32 %v1844_v47, %v2342_v25 }
 0x57c   : > { %v1846_v3 = vpop.eup %1845 }
 0x57d   : > { %v1381_v6 = vmul.f32 %v2361_v56, %v1365_v2  ;;  %v1366_v7 = vmul.f32 %v1846_v3, %v2344_v27 }
 0x57e   : > { %v1848_v50 = vpop.eup %1847 }
 0x57f   : > { %v1397_v61 = vadd.f32 %v2365_v58, %v1381_v6  ;;  %v1382_v18 = vmul.f32 %v2361_v56, %v1366_v7  ;;  %v1367_v9 = vmul.f32 %v1848_v50, %v2348_v30 }
 0x580   : > { %v1850_v11 = vpop.eup %1849 }
 0x581   : > { %v1409_v39 = vmax.f32 %v1397_v61, 0.0  ;;  %v1398_v22 = vadd.f32 %v2365_v58, %v1382_v18  ;;  %v1383_v25 = vmul.f32 %v2361_v56, %v1367_v9  ;;  %v1368_v14 = vmul.f32 %v1850_v11, %v2352_v59 }
 0x583   : > { %1421 = vst [vmem:[%s2378_s16 + $0x40] sm:$0xff] %v1409_v39  ;;  %v1410_v27 = vmax.f32 %v1398_v22, 0.0  ;;  %v1399_v13 = vadd.f32 %v2365_v58, %v1383_v25  ;;  %v1384_v16 = vmul.f32 %v2361_v56, %v1368_v14 }
 0x585   : > { %1422 = vst [vmem:[%s2378_s16 + $0x48] sm:$0xff] %v1410_v27  ;;  %v1411_v30 = vmax.f32 %v1399_v13, 0.0  ;;  %v1400_v17 = vadd.f32 %v2365_v58, %v1384_v16 }
 0x587   : > { %1423 = vst [vmem:[%s2378_s16 + $0x50] sm:$0xff] %v1411_v30  ;;  %v1412_v59 = vmax.f32 %v1400_v17, 0.0 }
 0x589   : > { %1424 = vst [vmem:[%s2378_s16 + $0x58] sm:$0xff] %v1412_v59 }
 0x58a   : > { %1864 = shalt.err (!%p1861_p4)
}
 0x58b   : > { %s1865_s10 = scalar_lea.hbm %s2422_s30, 1536  ;;  %s1869_s13 = scalar_lea.hbm %s2476_s5, 6144 }
 0x58c   : > { %p1866_p7 = scmp.ne.s32.totalorder %s2422_s30, %s1865_s10  ;;  %p1870_p10 = scmp.lt.u32.totalorder %s2422_s30, %s2476_s5 }
 0x58d   : > { %p1871_p11 = scmp.lt.u32.totalorder %s1869_s13, %s1865_s10  ;;  %p1873_p13 = scmp.lt.u32.totalorder %s1865_s10, %s2422_s30 }
 0x58e   : > { %p1867_p8 = pnand %p1866_p7, %p1991_p5 }
 0x58f   : > { %p1872_p12 = por %p1871_p11, %p1870_p10 }
 0x590   : > { %p1868_p9 = pneg %p1867_p8 }
 0x591   : > { %p1874_p0 = por %p1873_p13, %p1872_p12 }
 0x593   : > { %p1875_p1 = pnand %p1874_p0, %p1868_p9 }
 0x595   : > { %1878 = shalt.err (!%p1875_p1)
}
 0x596   : > { %s1921_s16 = smov 128   ;;  %s1922_s17 = smov 8  }
 0x597   : > { %1708 = dma.vmem_to_hbm [thread:$0]  (%p1991_p5), %s2424_s23, 1536, %s2422_s30, %s2430_s22, %s1921_s16, %s1921_s16, %s1922_s17  }
 0x598 PF: > { %p1714_p2 = scmp.ge.s32.totalorder %s1913_s21, 2  ;;  %s1454_s25 = sand.u32 1, %s1901_s18  }
 0x599   : > { %s1455_s26 = scalar_lea.sflag [#allocation3], %s1454_s25 }
 0x59a   : > { %p1711_p3 = pnand %p1714_p2, %p1995_p6 }
 0x59c   : > { %1896 = dma.done.wait (!%p1711_p3), %s1455_s26, 1536  }
 0x59d   : > { %1898 = vsyncadd (!%p1711_p3), %s1455_s26, 4294965760  ;;  %p15_p4 = scmp.ge.s32.totalorder %s1978_s24, 6   ;;  %s2479_s18 = smov %s1905_s19 }
 0x59e   : > { %s2480_s19 = smov %s1909_s20  ;;  %s2481_s20 = smov %s1989_s27 }
 0x59f   : > { %s2482_s21 = smov %s1978_s24  ;;  %17 = sbr.rel (!%p15_p4) target bundleno = 3 (0x3), region = 78 }
 0x5a6   :  { %1460 = vsyncpa [#allocation3], 1 }
 0x5a7   :  { %1462 = vsyncpa [#allocation3 + $0x1], 1 }

</bundles_post_ra>
